<compile_context>
chip_gen: v6e
topology: v6e:2x2x1
jax: 0.10.0
libtpu: 0.0.40
codegen_flags: <defaults>
</compile_context>

<pallas_src>
import jax
import jax.numpy as jnp
from jax.experimental import pallas as pl
from jax.experimental.pallas import tpu as pltpu


# ----------------------------------------------------------------------------
# Single-neuron forward (exact module semantics): VPU MAC with SMEM weights.
# ----------------------------------------------------------------------------
def _make_neuron_kernel(n_in: int):
    def kernel(*refs):
        w_ref = refs[0]                 # SMEM, shape (n_in,), f32 scalars
        x_refs = refs[1:1 + n_in]       # n_in VMEM refs, each (1, D)
        o_ref = refs[1 + n_in]          # VMEM, (1, D)
        # Unrolled broadcast multiply-accumulate on the VPU (MXU stays idle).
        acc = w_ref[0] * x_refs[0][...].astype(jnp.float32)
        for i in range(1, n_in):
            acc = acc + w_ref[i] * x_refs[i][...].astype(jnp.float32)
        o_ref[...] = acc.astype(o_ref.dtype)
        # act_fn = nn.Identity -> no-op.
    return kernel


def neuron_forward(weights, *xs):
    """weights: (n_in,) float32.  xs: n_in arrays, each of shape (D,)."""
    n_in = weights.shape[0]
    assert len(xs) == n_in, "Neuron.forward expects n_in input vectors"
    D = xs[0].shape[0]
    out_dtype = jnp.result_type(weights.dtype, xs[0].dtype)

    # (D,) -> (1, D): metadata-only, keeps the feature axis lane-dense; no
    # jnp.stack / concat HLO is emitted.
    xs2d = tuple(x.reshape(1, D) for x in xs)

    out = pl.pallas_call(
        _make_neuron_kernel(n_in),
        out_shape=jax.ShapeDtypeStruct((1, D), out_dtype),
        in_specs=[pl.BlockSpec(memory_space=pltpu.MemorySpace.SMEM)]      # weights
                 + [pl.BlockSpec(memory_space=pltpu.MemorySpace.VMEM)] * n_in,
        out_specs=pl.BlockSpec(memory_space=pltpu.MemorySpace.VMEM),
        cost_estimate=pl.CostEstimate(
            flops=2 * n_in * D,
            transcendentals=0,
            bytes_accessed=(n_in * D + n_in + D) * 4,
        ),
    )(weights.astype(jnp.float32), *xs2d)
    return out[0]                       # (D,)  == weights @ stack(xs)


# ----------------------------------------------------------------------------
# Batched variant (many neurons sharing the same inputs) — the structural win:
# one pallas_call amortizes launch overhead over N neurons and the (N, n_in) @
# (n_in, D) matmul is big enough for the MXU; output (N, D) is lane-dense.
# ----------------------------------------------------------------------------
def _neuron_batch_kernel(w_ref, x_ref, o_ref):
    o_ref[...] = jnp.dot(
        w_ref[...], x_ref[...], preferred_element_type=jnp.float32
    ).astype(o_ref.dtype)


def neuron_forward_batched(weights_nk, x_kd, *, tile_n=128):
    """weights_nk: (N, n_in).  x_kd: (n_in, D).  Returns (N, D)."""
    N, K = weights_nk.shape
    K2, D = x_kd.shape
    assert K == K2
    return pl.pallas_call(
        _neuron_batch_kernel,
        out_shape=jax.ShapeDtypeStruct((N, D), jnp.float32),
        grid=(pl.cdiv(N, tile_n),),
        in_specs=[
            pl.BlockSpec((tile_n, K), lambda i: (i, 0)),   # per-tile neuron weights
            pl.BlockSpec((K, D), lambda i: (0, 0)),        # shared inputs
        ],
        out_specs=pl.BlockSpec((tile_n, D), lambda i: (i, 0)),
        compiler_params=pltpu.CompilerParams(
            dimension_semantics=("parallel",)               # dual-TC on v7x
        ),
        cost_estimate=pl.CostEstimate(
            flops=2 * N * K * D,
            transcendentals=0,
            bytes_accessed=(N * K + K * D + N * D) * 4,
        ),
    )(weights_nk, x_kd)


def kaiming_normal_weights(key, n_in):
    # torch.nn.init.kaiming_normal_ on a (1, n_in) tensor:
    #   fan_in = n_in, gain = sqrt(2)  -> std = sqrt(2 / n_in)
    std = (2.0 / n_in) ** 0.5
    return jax.random.normal(key, (n_in,), dtype=jnp.float32) * std


if __name__ == "__main__":
    key = jax.random.PRNGKey(0)
    n_in = 4      # number of input vectors (the "dendrites")
    D = 32        # length of each input vector

    k_w, k_b, *k_xs = jax.random.split(key, n_in + 2)
    weights = kaiming_normal_weights(k_w, n_in)
    xs = [jax.random.normal(k, (D,), dtype=jnp.float32) for k in k_xs]

    # --- single-neuron (module semantics) -----------------------------------
    y = neuron_forward(weights, *xs)
    jax.block_until_ready(y)
    y_ref = weights @ jnp.stack(xs)
    assert y.shape == (D,)
    assert jnp.allclose(y, y_ref, atol=1e-5, rtol=1e-5)

    # --- batched demonstration (many Neurons fused into one call) -----------
    N_neurons, D_big = 256, 128
    kb_w, kb_x = jax.random.split(k_b)
    w_batch = jax.random.normal(kb_w, (N_neurons, n_in), dtype=jnp.float32) * (2.0 / n_in) ** 0.5
    x_batch = jax.random.normal(kb_x, (n_in, D_big), dtype=jnp.float32)
    yb = neuron_forward_batched(w_batch, x_batch)
    jax.block_until_ready(yb)
    yb_ref = w_batch @ x_batch
    assert yb.shape == (N_neurons, D_big)
    assert jnp.allclose(yb, yb_ref, atol=1e-4, rtol=1e-4)

    print("KERNEL_OK")
</pallas_src>

<mosaic_0001>
module attributes {stable_mosaic.version = 11 : i64} {
  func.func @kernel(%arg0: memref<4xf32, #tpu.memory_space<smem>>, %arg1: memref<1x32xf32, #tpu.memory_space<vmem>>, %arg2: memref<1x32xf32, #tpu.memory_space<vmem>>, %arg3: memref<1x32xf32, #tpu.memory_space<vmem>>, %arg4: memref<1x32xf32, #tpu.memory_space<vmem>>, %arg5: memref<1x32xf32, #tpu.memory_space<vmem>>) attributes {dimension_semantics = [], scalar_prefetch = 0 : i64, scratch_operands = 0 : i64, tpu.core_type = #tpu.core_type<tc>} {
    %c0 = arith.constant 0 : index
    %0 = memref.load %arg0[%c0] : memref<4xf32, #tpu.memory_space<smem>>
    %c0_0 = arith.constant 0 : index
    %c0_1 = arith.constant 0 : index
    %1 = vector.load %arg1[%c0_0, %c0_1] : memref<1x32xf32, #tpu.memory_space<vmem>>, vector<1x32xf32>
    %2 = vector.broadcast %0 : f32 to vector<1x32xf32>
    %3 = arith.mulf %2, %1 : vector<1x32xf32>
    %c1 = arith.constant 1 : index
    %4 = memref.load %arg0[%c1] : memref<4xf32, #tpu.memory_space<smem>>
    %c0_2 = arith.constant 0 : index
    %c0_3 = arith.constant 0 : index
    %5 = vector.load %arg2[%c0_2, %c0_3] : memref<1x32xf32, #tpu.memory_space<vmem>>, vector<1x32xf32>
    %6 = vector.broadcast %4 : f32 to vector<1x32xf32>
    %7 = arith.mulf %6, %5 : vector<1x32xf32>
    %8 = arith.addf %3, %7 : vector<1x32xf32>
    %c2 = arith.constant 2 : index
    %9 = memref.load %arg0[%c2] : memref<4xf32, #tpu.memory_space<smem>>
    %c0_4 = arith.constant 0 : index
    %c0_5 = arith.constant 0 : index
    %10 = vector.load %arg3[%c0_4, %c0_5] : memref<1x32xf32, #tpu.memory_space<vmem>>, vector<1x32xf32>
    %11 = vector.broadcast %9 : f32 to vector<1x32xf32>
    %12 = arith.mulf %11, %10 : vector<1x32xf32>
    %13 = arith.addf %8, %12 : vector<1x32xf32>
    %c3 = arith.constant 3 : index
    %14 = memref.load %arg0[%c3] : memref<4xf32, #tpu.memory_space<smem>>
    %c0_6 = arith.constant 0 : index
    %c0_7 = arith.constant 0 : index
    %15 = vector.load %arg4[%c0_6, %c0_7] : memref<1x32xf32, #tpu.memory_space<vmem>>, vector<1x32xf32>
    %16 = vector.broadcast %14 : f32 to vector<1x32xf32>
    %17 = arith.mulf %16, %15 : vector<1x32xf32>
    %18 = arith.addf %13, %17 : vector<1x32xf32>
    %c0_8 = arith.constant 0 : index
    %c0_9 = arith.constant 0 : index
    %19 = vector.load %arg5[%c0_8, %c0_9] : memref<1x32xf32, #tpu.memory_space<vmem>>, vector<1x32xf32>
    tpu.vector_store %arg5[%c0_8, %c0_9], %18 {strides = array<i32>} : memref<1x32xf32, #tpu.memory_space<vmem>>, vector<1x32xf32>,
    return
  }
}

</mosaic_0001>

<bundles_post_ra>
// kernel: tpu_custom_call.1
= control target key start
LH: loop header
LB: loop body
LE: loop exit
PB: predicated region body
PF: predicated region fallthrough
CT: control target
= control target key end

     0   :  { %10 = vsyncpa [#allocation4], 0  ;;  %s155_s0 = inlined_call_operand.hbm [shape: f32[4], index: 0, kind: input, shape index: {}]   ;;  %s156_s1 = inlined_call_operand.vmem [shape: f32[1,32], index: 1, kind: input, shape index: {}]   ;;  %s157_s2 = inlined_call_operand.vmem [shape: f32[1,32], index: 2, kind: input, shape index: {}]   ;;  %s158_s3 = inlined_call_operand.vmem [shape: f32[1,32], index: 3, kind: input, shape index: {}]   ;;  %s159_s4 = inlined_call_operand.vmem [shape: f32[1,32], index: 4, kind: input, shape index: {}]   ;;  %s160_s5 = inlined_call_operand.hbm [shape: f32[1,32], index: 5, kind: output, shape index: {}]  }
   0x1   :  { %11 = vsyncpa [#allocation3], 0  ;;  %s105_s18 = smov [#allocation2]  }
   0x2   :  { %19 = dma.hbm_to_smem %s155_s0, 16, %s105_s18, [#allocation4]  }
   0x3   :  { %101 = dma.done.wait [#allocation4], 16  }
   0x4   :  { %102 = vsyncadd [#allocation4], 4294967280 }
   0x5   :  { %31 = sfence }
   0x6   :  { %s32_s21 = sld [smem:[#allocation2]]  ;;  %v33_v0 = vld [vmem:[%s156_s1] sm:$0x1]  ;;  %s106_s1 = smov [#allocation5]   ;;  %vm51_vm0 = vcmask 253952  }
   0x7   :  { %s68_s22 = sld [smem:[#allocation2 + $0x1]]  ;;  %v37_v1 = vld [vmem:[%s157_s2] sm:$0x1]  ;;  %s59_s7 = sshll.u32 %s106_s1, 4  ;;  %s60_s7 = int_to_ptr.vmem [resolvable:$true] %s59_s7 }
   0x8   :  { %s69_s23 = sld [smem:[#allocation2 + $0x2]]  ;;  %v42_v3 = vld [vmem:[%s158_s3] sm:$0x1]  ;;  %s81_s2 = scalar_lea.vmem %s60_s7, 16 }
   0x9   :  { %s70_s24 = sld [smem:[#allocation2 + $0x3]]  ;;  %v47_v6 = vld [vmem:[%s159_s4] sm:$0x1]  ;;  %p82_p0 = scmp.ne.s32.totalorder %s60_s7, %s81_s2 }
   0xa   :  { %s85_s3 = scalar_lea.vmem %s60_s7, 32  ;;  %p86_p1 = scmp.lt.s32.totalorder %s60_s7, %s60_s7 }
   0xb   :  { %p87_p2 = scmp.lt.s32.totalorder %s85_s3, %s81_s2 }
   0xc   :  { %v34_v2 = vstv %s32_s21 }
   0xd   :  { %v35_v4 = vmul.f32 %v34_v2, %v33_v0  ;;  %v38_v5 = vstv %s68_s22  ;;  %p88_p3 = por %p87_p2, %p86_p1 }
   0xe   :  { %v39_v7 = vmul.f32 %v38_v5, %v37_v1  ;;  %v43_v8 = vstv %s69_s23 }
   0xf   :  { %v44_v9 = vmul.f32 %v43_v8, %v42_v3  ;;  %v48_v10 = vstv %s70_s24  ;;  %p89_p4 = pnand %p88_p3, %p82_p0 }
  0x10   :  { %v40_v11 = vadd.f32 %v39_v7, %v35_v4  ;;  %v49_v12 = vmul.f32 %v48_v10, %v47_v6 }
  0x12   :  { %v45_v13 = vadd.f32 %v44_v9, %v40_v11 }
  0x14   :  { %v50_v14 = vadd.f32 %v49_v12, %v45_v13 }
  0x16   :  { %52 = vst.msk [vmem:[#allocation5] sm:$0x1] %vm51_vm0, %v50_v14 }
  0x17   :  { %92 = shalt.err (!%p89_p4)
}
  0x18   :  { %62 = dma.vmem_to_hbm [thread:$0]  %s60_s7, 16, %s160_s5, [#allocation3]  }
  0x19   :  { %103 = dma.done.wait [#allocation3], 16  }
  0x1a   :  { %104 = vsyncadd [#allocation3], 4294967280 }
  0x1b   :  { %66 = vsyncpa [#allocation3], 1 }
  0x1c   :  { %67 = vsyncpa [#allocation4], 1 }

</bundles_post_ra>
